<compile_context>
chip_gen: v7x
topology: tpu7x:2x2x1
jax: 0.10.0
libtpu: 0.0.40
codegen_flags: <defaults>
</compile_context>

<pallas_src>
import math

import jax
import jax.numpy as jnp
from jax import lax
from jax.experimental import pallas as pl
from jax.experimental.pallas import tpu as pltpu

D_K = D_V = 64  # matches `d_k = d_v = 64` in the PyTorch source
_MIB = 1024 * 1024


def _sdpa_kernel(q_ref, k_ref, v_ref, mask_ref, ctx_ref, attn_ref):
    # Block shapes per grid step (b, h, i):
    #   q_ref    : (1, 1, TQ, d_k)
    #   k_ref    : (1, 1, Lk, d_k)   resident across the Lq axis
    #   v_ref    : (1, 1, Lk, d_v)   resident across the Lq axis
    #   mask_ref : (1, 1, TQ, Lk)    caller's dtype; 0 == "mask out"
    #   ctx_ref  : (1, 1, TQ, d_v)
    #   attn_ref : (1, 1, TQ, Lk)
    q = q_ref[0, 0]
    k = k_ref[0, 0]
    v = v_ref[0, 0]
    m = mask_ref[0, 0]

    scale = 1.0 / math.sqrt(D_K)
    if q.dtype == jnp.float32:
        # Fold 1/sqrt(d_k) into Q (TQ*d_k mults instead of TQ*Lk); exact in f32.
        q = q * jnp.float32(scale)
        scores = lax.dot_general(q, k, (((1,), (1,)), ((), ())),
                                 preferred_element_type=jnp.float32)
    else:
        # bf16 Q: scaling Q would round before the matmul; scale the f32
        # scores instead, matching PyTorch's f32 divide.
        scores = lax.dot_general(q, k, (((1,), (1,)), ((), ())),
                                 preferred_element_type=jnp.float32)
        scores = scores * jnp.float32(scale)

    # masked_fill_(attn_mask == 0, -1e9) on the native mask dtype.
    scores = jnp.where(m == 0, jnp.float32(-1.0e9), scores)

    # Numerically stable softmax in f32 with an EXACT normalization
    # (approx reciprocal was the source of the previous parity failure).
    s_max = jnp.max(scores, axis=-1, keepdims=True)
    e = jnp.exp(scores - s_max)
    denom = jnp.sum(e, axis=-1, keepdims=True)
    attn = e / denom

    # context = attn @ V; probabilities in V's dtype so bf16 inputs run the
    # MXU at full rate; accumulation stays f32.
    ctx = lax.dot_general(attn.astype(v.dtype), v, (((1,), (0,)), ((), ())),
                          preferred_element_type=jnp.float32)

    ctx_ref[0, 0] = ctx.astype(ctx_ref.dtype)
    attn_ref[0, 0] = attn.astype(attn_ref.dtype)


def _isz(dt) -> int:
    return jnp.dtype(dt).itemsize


def _vmem_capacity_bytes() -> int:
    """Physical VMEM of the current chip; conservative 64 MiB (v7x) fallback."""
    try:
        cap = getattr(pltpu.get_tpu_info(), "vmem_capacity_bytes", None)
        if cap:
            return int(cap)
    except Exception:
        pass
    return 64 * _MIB


def _choose_tq(lq, lk, dk, dv, itemsizes, budget_bytes):
    """Largest Lq tile whose per-step footprint fits the VMEM budget.

    Counts double-buffered pipeline blocks for every operand plus ~3 live
    (TQ, Lk) f32 temporaries (scores / exp / attn), so the choice is Lk-aware
    and keeps 2-deep pipelining resident even on v7x's 64 MiB VMEM.
    """
    q_b, k_b, v_b, m_b, ctx_b, attn_b = itemsizes

    def footprint(tq):
        blocks = 2 * (tq * dk * q_b + lk * dk * k_b + lk * dv * v_b
                      + tq * lk * m_b + tq * dv * ctx_b + tq * lk * attn_b)
        temps = 3 * tq * lk * 4
        return blocks + temps

    divisors = [c for c in (1024, 512, 256, 128, 64, 32) if lq % c == 0]
    for cand in divisors:
        if footprint(cand) <= budget_bytes:
            return cand
    if divisors:
        # TODO(synk): for very long Lk, chunk Lk in-kernel (streaming max/sum)
        # instead of only shrinking TQ.
        return divisors[-1]
    return lq  # tiny shapes: full-extent blocks are always legal


def scaled_dot_product_attention(Q, K, V, attn_mask, *, attn_dtype=jnp.float32):
    """Pallas equivalent of ScaledDotProductAttention.forward.

    attn_mask may be any integer/bool dtype (0 == mask out); it is consumed
    directly by the kernel — no wrapper-side conversion pass. Pass bool/int8
    masks to minimize HBM traffic. `attn_dtype=jnp.bfloat16` halves the
    dominant O(L^2) attn writeback if the caller tolerates it; the default
    float32 matches the PyTorch module exactly.
    """
    B, H, Lq, dk = Q.shape
    Lk = K.shape[2]
    dv = V.shape[3]

    # Per-chip VMEM budgeting: ~100 MiB limit on v5e/v6e (128 MiB physical),
    # capacity - 16 MiB on v7x (64 MiB physical).
    cap = _vmem_capacity_bytes()
    vmem_limit = 100 * _MIB if cap >= 128 * _MIB else max(32 * _MIB, cap - 16 * _MIB)
    budget = int(vmem_limit * 0.7)  # headroom for compiler-internal scratch

    TQ = _choose_tq(
        Lq, Lk, dk, dv,
        (_isz(Q.dtype), _isz(K.dtype), _isz(V.dtype), _isz(attn_mask.dtype),
         _isz(Q.dtype), _isz(attn_dtype)),
        budget)
    grid = (B, H, Lq // TQ)

    q_idx = lambda b, h, i: (b, h, i, 0)    # blocks that move with the Lq axis
    kv_idx = lambda b, h, i: (b, h, 0, 0)   # K/V reused across Lq tiles

    in_specs = [
        pl.BlockSpec((1, 1, TQ, dk), q_idx),
        pl.BlockSpec((1, 1, Lk, dk), kv_idx),
        pl.BlockSpec((1, 1, Lk, dv), kv_idx),
        pl.BlockSpec((1, 1, TQ, Lk), q_idx),
    ]
    out_specs = [
        pl.BlockSpec((1, 1, TQ, dv), q_idx),
        pl.BlockSpec((1, 1, TQ, Lk), q_idx),
    ]
    out_shape = [
        jax.ShapeDtypeStruct((B, H, Lq, dv), Q.dtype),
        jax.ShapeDtypeStruct((B, H, Lq, Lk), attn_dtype),
    ]

    # Advisory cost hint so XLA can overlap neighbouring ops with this
    # (HBM-bound) custom call.
    bytes_accessed = (Q.size * _isz(Q.dtype) + K.size * _isz(K.dtype)
                      + V.size * _isz(V.dtype)
                      + attn_mask.size * _isz(attn_mask.dtype)
                      + B * H * Lq * dv * _isz(Q.dtype)
                      + B * H * Lq * Lk * _isz(attn_dtype))
    cost = pl.CostEstimate(
        flops=2 * B * H * Lq * Lk * (dk + dv),
        transcendentals=B * H * Lq * Lk,
        bytes_accessed=int(bytes_accessed),
    )

    ctx, attn = pl.pallas_call(
        _sdpa_kernel,
        grid_spec=pltpu.PrefetchScalarGridSpec(
            num_scalar_prefetch=0,
            grid=grid,
            in_specs=in_specs,
            out_specs=out_specs,
        ),
        out_shape=out_shape,
        compiler_params=pltpu.CompilerParams(
            # Lq axis "arbitrary": v7x megacore shards over B/H, so each core
            # keeps its K/V block resident across its Lq tiles.
            dimension_semantics=("parallel", "parallel", "arbitrary"),
            vmem_limit_bytes=vmem_limit,
        ),
        cost_estimate=cost,
    )(Q, K, V, attn_mask)
    return ctx, attn


def _reference(Q, K, V, attn_mask):
    # precision=HIGHEST so the f32 reference matmuls are not bf16-truncated by
    # XLA's default TPU matmul precision (that mismatch tripped the old test).
    hp = lax.Precision.HIGHEST
    scores = jnp.einsum("bhqd,bhkd->bhqk", Q.astype(jnp.float32),
                        K.astype(jnp.float32), precision=hp) / math.sqrt(D_K)
    scores = jnp.where(attn_mask == 0, jnp.float32(-1.0e9), scores)
    attn = jax.nn.softmax(scores, axis=-1)
    ctx = jnp.einsum("bhqk,bhkd->bhqd", attn, V.astype(jnp.float32), precision=hp)
    return ctx, attn


if __name__ == "__main__":
    key = jax.random.PRNGKey(0)
    kq, kk, kv, km = jax.random.split(key, 4)

    B, H, L = 2, 2, 8  # small shapes; d_k = d_v = 64 per the module constants
    Q = jax.random.normal(kq, (B, H, L, D_K), dtype=jnp.float32)
    K = jax.random.normal(kk, (B, H, L, D_K), dtype=jnp.float32)
    V = jax.random.normal(kv, (B, H, L, D_V), dtype=jnp.float32)
    # attn_mask: 0 means "mask out" (same convention as masked_fill(mask == 0)).
    attn_mask = (jax.random.uniform(km, (B, H, L, L)) > 0.3).astype(jnp.int32)
    attn_mask = attn_mask.at[..., 0].set(1)  # no fully-masked rows

    ctx, attn = scaled_dot_product_attention(Q, K, V, attn_mask)
    jax.block_until_ready((ctx, attn))

    ctx_ref, attn_ref = _reference(Q, K, V, attn_mask)

    # Structural checks (independent of MXU pass decomposition).
    row_sums = jnp.sum(attn, axis=-1)
    assert jnp.allclose(row_sums, 1.0, atol=1e-5), "softmax rows must sum to 1"
    assert float(jnp.max(jnp.where(attn_mask == 0, attn, 0.0))) < 1e-6, \
        "masked positions must have ~0 probability"

    # Value checks vs the precision=HIGHEST f32 reference. The tolerance
    # covers the MXU's bf16-pass decomposition of f32 matmuls; typical error
    # is orders of magnitude smaller.
    assert jnp.allclose(ctx, ctx_ref, atol=1e-2, rtol=1e-2)
    assert jnp.allclose(attn, attn_ref, atol=1e-2, rtol=1e-2)

    print("KERNEL_OK")
</pallas_src>

<mosaic_0001>
module attributes {stable_mosaic.version = 11 : i64} {
  func.func @_sdpa_kernel(%arg0: i32, %arg1: i32, %arg2: i32, %arg3: memref<1x1x8x64xf32, #tpu.memory_space<vmem>>, %arg4: memref<1x1x8x64xf32, #tpu.memory_space<vmem>>, %arg5: memref<1x1x8x64xf32, #tpu.memory_space<vmem>>, %arg6: memref<1x1x8x8xi32, #tpu.memory_space<vmem>>, %arg7: memref<1x1x8x64xf32, #tpu.memory_space<vmem>>, %arg8: memref<1x1x8x8xf32, #tpu.memory_space<vmem>>) attributes {dimension_semantics = [#tpu.dimension_semantics<parallel>, #tpu.dimension_semantics<parallel>, #tpu.dimension_semantics<arbitrary>], iteration_bounds = array<i64: 2, 2, 1>, scalar_prefetch = 0 : i64, scratch_operands = 0 : i64, tpu.core_type = #tpu.core_type<tc>, window_params = [{transform_indices = @transform_0, window_bounds = array<i64: 1, 1, 8, 64>}, {transform_indices = @transform_1, window_bounds = array<i64: 1, 1, 8, 64>}, {transform_indices = @transform_2, window_bounds = array<i64: 1, 1, 8, 64>}, {transform_indices = @transform_3, window_bounds = array<i64: 1, 1, 8, 8>}, {transform_indices = @transform_4, window_bounds = array<i64: 1, 1, 8, 64>}, {transform_indices = @transform_5, window_bounds = array<i64: 1, 1, 8, 8>}]} {
    %c0 = arith.constant 0 : index
    %c0_0 = arith.constant 0 : index
    %c0_1 = arith.constant 0 : index
    %c0_2 = arith.constant 0 : index
    %0 = vector.load %arg3[%c0, %c0_0, %c0_1, %c0_2] : memref<1x1x8x64xf32, #tpu.memory_space<vmem>>, vector<1x1x8x64xf32>
    %1 = vector.shape_cast %0 : vector<1x1x8x64xf32> to vector<8x64xf32>
    %c0_3 = arith.constant 0 : index
    %c0_4 = arith.constant 0 : index
    %c0_5 = arith.constant 0 : index
    %c0_6 = arith.constant 0 : index
    %2 = vector.load %arg4[%c0_3, %c0_4, %c0_5, %c0_6] : memref<1x1x8x64xf32, #tpu.memory_space<vmem>>, vector<1x1x8x64xf32>
    %3 = vector.shape_cast %2 : vector<1x1x8x64xf32> to vector<8x64xf32>
    %c0_7 = arith.constant 0 : index
    %c0_8 = arith.constant 0 : index
    %c0_9 = arith.constant 0 : index
    %c0_10 = arith.constant 0 : index
    %4 = vector.load %arg5[%c0_7, %c0_8, %c0_9, %c0_10] : memref<1x1x8x64xf32, #tpu.memory_space<vmem>>, vector<1x1x8x64xf32>
    %5 = vector.shape_cast %4 : vector<1x1x8x64xf32> to vector<8x64xf32>
    %c0_11 = arith.constant 0 : index
    %c0_12 = arith.constant 0 : index
    %c0_13 = arith.constant 0 : index
    %c0_14 = arith.constant 0 : index
    %6 = vector.load %arg6[%c0_11, %c0_12, %c0_13, %c0_14] : memref<1x1x8x8xi32, #tpu.memory_space<vmem>>, vector<1x1x8x8xi32>
    %7 = vector.shape_cast %6 : vector<1x1x8x8xi32> to vector<8x8xi32>
    %cst = arith.constant 1.250000e-01 : f32
    %8 = vector.broadcast %cst : f32 to vector<8x64xf32>
    %9 = arith.mulf %1, %8 : vector<8x64xf32>
    %cst_15 = arith.constant dense<0.000000e+00> : vector<8x8xf32>
    %10 = tpu.matmul %9, %3, %cst_15 {dimension_numbers = #tpu.dot_dimension_numbers<[1], [1], [0], [0], [0, 0, 1, 0], [], []>} : vector<8x64xf32>, vector<8x64xf32>, vector<8x8xf32> -> vector<8x8xf32>
    %c0_i32 = arith.constant 0 : i32
    %11 = vector.broadcast %c0_i32 : i32 to vector<8x8xi32>
    %12 = arith.cmpi eq, %7, %11 : vector<8x8xi32>
    %cst_16 = arith.constant -1.000000e+09 : f32
    %13 = vector.broadcast %cst_16 : f32 to vector<8x8xf32>
    %14 = arith.select %12, %13, %10 : vector<8x8xi1>, vector<8x8xf32>
    %cst_17 = arith.constant dense<0xFF800000> : vector<8xf32>
    %15 = vector.multi_reduction <maximumf>, %14, %cst_17 [1] : vector<8x8xf32> to vector<8xf32>
    %16 = vector.shape_cast %15 : vector<8xf32> to vector<8x1xf32>
    %17 = vector.broadcast %16 : vector<8x1xf32> to vector<8x8xf32>
    %18 = arith.subf %14, %17 : vector<8x8xf32>
    %19 = math.exp %18 : vector<8x8xf32>
    %cst_18 = arith.constant dense<0.000000e+00> : vector<8xf32>
    %20 = vector.multi_reduction <add>, %19, %cst_18 [1] : vector<8x8xf32> to vector<8xf32>
    %21 = vector.shape_cast %20 : vector<8xf32> to vector<8x1xf32>
    %22 = vector.broadcast %21 : vector<8x1xf32> to vector<8x8xf32>
    %23 = arith.divf %19, %22 : vector<8x8xf32>
    %cst_19 = arith.constant dense<0.000000e+00> : vector<8x64xf32>
    %24 = tpu.matmul %23, %5, %cst_19 {dimension_numbers = #tpu.dot_dimension_numbers<[1], [0], [0], [1], [0, 0, 1, 1], [], []>} : vector<8x8xf32>, vector<8x64xf32>, vector<8x64xf32> -> vector<8x64xf32>
    %c0_20 = arith.constant 0 : index
    %c0_21 = arith.constant 0 : index
    %c0_22 = arith.constant 0 : index
    %c0_23 = arith.constant 0 : index
    %25 = vector.load %arg7[%c0_20, %c0_21, %c0_22, %c0_23] : memref<1x1x8x64xf32, #tpu.memory_space<vmem>>, vector<1x1x8x64xf32>
    %26 = vector.shape_cast %25 : vector<1x1x8x64xf32> to vector<8x64xf32>
    %27 = vector.shape_cast %24 : vector<8x64xf32> to vector<1x1x8x64xf32>
    tpu.vector_store %arg7[%c0_20, %c0_21, %c0_22, %c0_23], %27 {strides = array<i32>} : memref<1x1x8x64xf32, #tpu.memory_space<vmem>>, vector<1x1x8x64xf32>,
    %c0_24 = arith.constant 0 : index
    %c0_25 = arith.constant 0 : index
    %c0_26 = arith.constant 0 : index
    %c0_27 = arith.constant 0 : index
    %28 = vector.load %arg8[%c0_24, %c0_25, %c0_26, %c0_27] : memref<1x1x8x8xf32, #tpu.memory_space<vmem>>, vector<1x1x8x8xf32>
    %29 = vector.shape_cast %28 : vector<1x1x8x8xf32> to vector<8x8xf32>
    %30 = vector.shape_cast %23 : vector<8x8xf32> to vector<1x1x8x8xf32>
    tpu.vector_store %arg8[%c0_24, %c0_25, %c0_26, %c0_27], %30 {strides = array<i32>} : memref<1x1x8x8xf32, #tpu.memory_space<vmem>>, vector<1x1x8x8xf32>,
    return
  }
  func.func @transform_0(%arg0: i32, %arg1: i32, %arg2: i32) -> (i32, i32, i32, i32) {
    %c0_i32 = arith.constant 0 : i32
    %c0_i32_0 = arith.constant 0 : i32
    return %arg0, %arg1, %arg2, %c0_i32 : i32, i32, i32, i32
  }
  func.func @transform_1(%arg0: i32, %arg1: i32, %arg2: i32) -> (i32, i32, i32, i32) {
    %c0_i32 = arith.constant 0 : i32
    %c0_i32_0 = arith.constant 0 : i32
    %c0_i32_1 = arith.constant 0 : i32
    return %arg0, %arg1, %c0_i32, %c0_i32_0 : i32, i32, i32, i32
  }
  func.func @transform_2(%arg0: i32, %arg1: i32, %arg2: i32) -> (i32, i32, i32, i32) {
    %c0_i32 = arith.constant 0 : i32
    %c0_i32_0 = arith.constant 0 : i32
    %c0_i32_1 = arith.constant 0 : i32
    return %arg0, %arg1, %c0_i32, %c0_i32_0 : i32, i32, i32, i32
  }
  func.func @transform_3(%arg0: i32, %arg1: i32, %arg2: i32) -> (i32, i32, i32, i32) {
    %c0_i32 = arith.constant 0 : i32
    %c0_i32_0 = arith.constant 0 : i32
    return %arg0, %arg1, %arg2, %c0_i32 : i32, i32, i32, i32
  }
  func.func @transform_4(%arg0: i32, %arg1: i32, %arg2: i32) -> (i32, i32, i32, i32) {
    %c0_i32 = arith.constant 0 : i32
    %c0_i32_0 = arith.constant 0 : i32
    return %arg0, %arg1, %arg2, %c0_i32 : i32, i32, i32, i32
  }
  func.func @transform_5(%arg0: i32, %arg1: i32, %arg2: i32) -> (i32, i32, i32, i32) {
    %c0_i32 = arith.constant 0 : i32
    %c0_i32_0 = arith.constant 0 : i32
    return %arg0, %arg1, %arg2, %c0_i32 : i32, i32, i32, i32
  }
}

</mosaic_0001>

<bundles_post_ra>
// kernel: tpu_custom_call.1
= control target key start
LH: loop header
LB: loop body
LE: loop exit
PB: predicated region body
PF: predicated region fallthrough
CT: control target
= control target key end

     0   :  { %s1622_s0 = inlined_call_operand.hbm [shape: f32[2,2,8,64], index: 0, kind: input, shape index: {}]   ;;  %s1623_s1 = inlined_call_operand.hbm [shape: f32[2,2,8,64], index: 1, kind: input, shape index: {}]   ;;  %s1624_s2 = inlined_call_operand.hbm [shape: f32[2,2,8,64], index: 2, kind: input, shape index: {}]   ;;  %s1625_s3 = inlined_call_operand.hbm [shape: s32[2,2,8,8], index: 3, kind: input, shape index: {}]   ;;  %s1626_s4 = inlined_call_operand.hbm [shape: f32[2,2,8,64], index: 4, kind: output, shape index: {0}]   ;;  %s1627_s5 = inlined_call_operand.hbm [shape: f32[2,2,8,8], index: 5, kind: output, shape index: {1}]  }
   0x1   :  { %1641 = sst [smem:[#allocation27_spill]] %s1623_s1 }
   0x2   :  { %11 = vsyncpa [#allocation3], 0 }
   0x3   :  { %13 = vsyncpa [#allocation3 + $0x1], 0 }
   0x4   :  { %14 = vsyncpa [#allocation6], 0 }
   0x5   :  { %16 = vsyncpa [#allocation6 + $0x1], 0 }
   0x6   :  { %17 = vsyncpa [#allocation9], 0 }
   0x7   :  { %19 = vsyncpa [#allocation9 + $0x1], 0 }
   0x8   :  { %20 = vsyncpa [#allocation4], 0 }
   0x9   :  { %22 = vsyncpa [#allocation4 + $0x1], 0 }
   0xa   :  { %23 = vsyncpa [#allocation12], 0 }
   0xb   :  { %25 = vsyncpa [#allocation12 + $0x1], 0  ;;  %s1265_s18 = smov 0   ;;  %s1267_s19 = smov 0  }
   0xc   :  { %s1269_s20 = smov 0   ;;  %s1271_s21 = smov 0  }
   0xd   :  { %s1273_s22 = smov 0   ;;  %s1275_s23 = smov 0  }
   0xe   :  { %s1277_s24 = smov 0   ;;  %s1279_s25 = smov 0  }
   0xf LB: > { %1642 = sst [smem:[#allocation18_spill]] %s1197_s18  ;;  %s1306_s26 = sadd.s32 4294967295, %s1225_s25   ;;  %s1225_s25 = sphi %s1279_s25, %s31_s25   ;;  %s1221_s24 = sphi %s1277_s24, %s1675_s24   ;;  %s1217_s23 = sphi %s1275_s23, %s1674_s23   ;;  %s1213_s22 = sphi %s1273_s22, %s1673_s22   ;;  %s1209_s21 = sphi %s1271_s21, %s1672_s21   ;;  %s1205_s20 = sphi %s1269_s20, %s1671_s20   ;;  %s1201_s19 = sphi %s1267_s19, %s1677_s19   ;;  %s1197_s18 = sphi %s1265_s18, %s1676_s18  }
  0x10   : > { %1643 = sst [smem:[#allocation19_spill]] %s1205_s20  ;;  %s816_s27 = sadd.s32 4294967294, %s1225_s25  }
  0x11   : > { %1644 = sst [smem:[#allocation20_spill]] %s1217_s23  ;;  %s46_s28 = sadd.s32 1, %s1217_s23 }
  0x12   : > { %1645 = sst [smem:[#allocation21_spill]] %s1221_s24  ;;  %s50_s29 = sadd.s32 1, %s1221_s24 }
  0x13   : > { %1646 = sst [smem:[#allocation22_spill]] %s1225_s25  ;;  %p48_p0 = scmp.ge.s32.totalorder %s46_s28, 2 }
  0x14   : > { %s61_s30 = sadd.s32 1, %s1205_s20  ;;  %p68_p1 = scmp.ne.s32.totalorder %s1205_s20, %s1201_s19 }
  0x15   : > { %p69_p2 = scmp.eq.s32.totalorder %s1225_s25, 0  ;;  %s1679_s28 = smov (%p48_p0, %s46_s28), 0 }
  0x16   : > { %1647 = sst [smem:[#allocation23_spill]] %s1679_s28  ;;  %s1681_s29 = smov (!%p48_p0, %s50_s29), %s1221_s24 }
  0x17   : > { %s55_s6 = ssub.s32 %s1217_s23, %s1679_s28  ;;  %p1320_p3 = por %p69_p2, %p68_p1 }
  0x18   : > { %p52_p4 = scmp.ge.s32.totalorder %s1681_s29, 2  ;;  %p74_p5 = scmp.ne.s32.totalorder %s1201_s19, %s1197_s18 }
  0x19   : > { %p75_p6 = scmp.eq.s32.totalorder %s1306_s26, 0  ;;  %p188_p7 = scmp.eq.s32.totalorder %s1306_s26, 3 }
  0x1a   : > { %s1683_s29 = smov (%p52_p4, %s1681_s29), 0  ;;  %p194_p10 = scmp.eq.s32.totalorder %s816_s27, 3 }
  0x1b   : > { %1649 = sst [smem:[#allocation24_spill]] %s1683_s29  ;;  %p1330_p8 = por %p75_p6, %p74_p5 }
  0x1c   : > { %p1334_p9 = por %p188_p7, %p68_p1  ;;  %s54_s10 = ssub.s32 %s1221_s24, %s1683_s29 }
  0x1d   : > { %s1650_s8 = scalar_select %p1330_p8, 1, 0 }
  0x1e   : > { %s1651_s9 = scalar_select %p1334_p9, 1, 0 }
  0x1f   : > { %s56_s11 = sor.u32 %s55_s6, %s54_s10  ;;  %p1340_p12 = por %p194_p10, %p74_p5 }
  0x20   : > { %p59_p11 = scmp.eq.s32.totalorder %s56_s11, 0  ;;  %p895_p13 = scmp.lt.s32.totalorder %s1225_s25, 4 }
  0x21   : > { %s1652_s12 = scalar_select %p1340_p12, 1, 0 }
  0x22   : > { %s1346_s13 = sand.u32 1, %s1205_s20   ;;  %s820_s16 = sshll.u32 %s1221_s24, 1 }
  0x23   : > { %1653 = sst [smem:[#allocation25_spill]] %s1652_s12  ;;  %s1352_s15 = sshll.u32 %s1346_s13, 3 }
  0x24   : > { %s1349_s14 = scalar_select %p59_p11, %s1205_s20, %s61_s30  }
  0x25   : > { %s254_s17 = sadd.s32 %s1217_s23, %s820_s16  ;;  %p1358_p0 = pnand %p895_p13, %p1320_p3 }
  0x26   : > { %1654 = sst [smem:[#allocation26_spill]] %s1349_s14  ;;  %s1362_s6 = sshll.u32 %s254_s17, 7 }
  0x27   : > { %s1655_s27 = scalar_select %p1358_p0, 1, 0 }
  0x28   : > { %s265_s10 = sand.u32 1, %s1225_s25   ;;  %s1656_s1 = sld [smem:[#allocation27_spill]] }
  0x29   : > { %s269_s16 = scalar_lea.vmem [#allocation5], %s1352_s15  ;;  %s1376_s28 = scalar_lea.sflag [#allocation6], %s265_s10 }
  0x2a   : > { %s278_s7 = sshll.u32 %s269_s16, 4  ;;  %p1382_p4 = pneg %p1358_p0  ;;  %s1373_s7 = int_to_ptr.vmem [resolvable:$true] %s278_s7 }
  0x2e   : > { %s1369_s30 = scalar_lea.hbm %s1656_s1, %s1362_s6  ;;  %s972_s16 = scalar_lea.hbm %s1656_s1, 512 }
  0x2f   : > { %s967_s17 = scalar_lea.hbm %s1369_s30, 128  ;;  %p973_p7 = scmp.lt.u32.totalorder %s1369_s30, %s1656_s1 }
  0x30   : > { %p968_p3 = scmp.ne.s32.totalorder %s1369_s30, %s967_s17  ;;  %p974_p10 = scmp.lt.u32.totalorder %s972_s16, %s967_s17 }
  0x31   : > { %p976_p13 = scmp.lt.u32.totalorder %s967_s17, %s1369_s30 }
  0x32   : > { %p970_p5 = pnand %p1382_p4, %p968_p3  ;;  %p975_p11 = por %p974_p10, %p973_p7 }
  0x34   : > { %p971_p6 = pneg %p970_p5  ;;  %p977_p1 = por %p976_p13, %p975_p11 }
  0x36   : > { %p978_p2 = pnand %p977_p1, %p971_p6 }
  0x38   : > { %981 = shalt.err (!%p978_p2)
}
  0x39   : > { %s982_s10 = scalar_lea.vmem %s1373_s7, 128  ;;  %s1227_s29 = smov [#allocation5]  }
  0x3a   : > { %p983_p3 = scmp.ne.s32.totalorder %s1373_s7, %s982_s10  ;;  %s987_s11 = sshll.u32 %s1227_s29, 4  ;;  %s988_s11 = int_to_ptr.vmem [resolvable:$false] %s987_s11 }
  0x3b   : > { %s989_s23 = scalar_lea.vmem %s988_s11, 256  ;;  %p990_p9 = scmp.lt.s32.totalorder %s1373_s7, %s988_s11 }
  0x3c   : > { %p985_p5 = pnand %p983_p3, %p1382_p4  ;;  %p991_p8 = scmp.lt.s32.totalorder %s989_s23, %s982_s10 }
  0x3e   : > { %p986_p12 = pneg %p985_p5  ;;  %p992_p7 = por %p991_p8, %p990_p9 }
  0x40   : > { %p993_p10 = pnand %p992_p7, %p986_p12 }
  0x42   : > { %996 = shalt.err (!%p993_p10)
}
  0x43   : > { %881 = dma.hbm_to_vmem [thread:$0]  (!%p1358_p0), %s1369_s30, 128, %s1373_s7, %s1376_s28  }
  0x44   : > { %p1658_p1 = scmp.lt.s32.totalorder %s1225_s25, 5  ;;  %p1659_p2 = scmp.ge.s32.totalorder %s1225_s25, 1 }
  0x45   : > { %s1418_s10 = scalar_lea.hbm %s1622_s0, %s1362_s6  ;;  %s248_s29 = scalar_lea.vmem [#allocation2], %s1352_s15 }
  0x46   : > { %p1410_p6 = pnand %p1659_p2, %p1658_p1  ;;  %s258_s11 = sshll.u32 %s248_s29, 4  ;;  %s1421_s11 = int_to_ptr.vmem [resolvable:$true] %s258_s11 }
  0x47   : > { %s1427_s23 = scalar_lea.hbm %s1624_s2, %s1362_s6  ;;  %s245_s1 = scalar_lea.sflag [#allocation3], %s1346_s13 }
  0x48   : > { %s1660_s14 = scalar_select %p1410_p6, 1, 0 }
  0x49   : > { %s997_s20 = scalar_lea.hbm %s1418_s10, 128  ;;  %s1002_s12 = scalar_lea.hbm %s1622_s0, 512 }
  0x4a   : > { %p998_p8 = scmp.ne.s32.totalorder %s1418_s10, %s997_s20  ;;  %p1003_p11 = scmp.lt.u32.totalorder %s1418_s10, %s1622_s0 }
  0x4b   : > { %p1004_p13 = scmp.lt.u32.totalorder %s1002_s12, %s997_s20  ;;  %p1006_p5 = scmp.lt.u32.totalorder %s997_s20, %s1418_s10 }
  0x4c   : > { %p1000_p9 = pnand %p998_p8, %p1382_p4 }
  0x4d   : > { %p1005_p3 = por %p1004_p13, %p1003_p11 }
  0x4e   : > { %p1001_p12 = pneg %p1000_p9 }
  0x4f   : > { %p1007_p7 = por %p1006_p5, %p1005_p3 }
  0x51   : > { %p1008_p10 = pnand %p1007_p7, %p1001_p12 }
  0x53   : > { %1011 = shalt.err (!%p1008_p10)
}
  0x54   : > { %s1012_s29 = scalar_lea.vmem %s1421_s11, 128  ;;  %s1228_s30 = smov [#allocation2]  }
  0x55   : > { %p1013_p1 = scmp.ne.s32.totalorder %s1421_s11, %s1012_s29  ;;  %s1017_s7 = sshll.u32 %s1228_s30, 4  ;;  %s1018_s7 = int_to_ptr.vmem [resolvable:$false] %s1017_s7 }
  0x56   : > { %s1019_s18 = scalar_lea.vmem %s1018_s7, 256  ;;  %p1020_p9 = scmp.lt.s32.totalorder %s1421_s11, %s1018_s7 }
  0x57   : > { %p1015_p2 = pnand %p1013_p1, %p1382_p4  ;;  %p1021_p6 = scmp.lt.s32.totalorder %s1019_s18, %s1012_s29 }
  0x59   : > { %p1016_p8 = pneg %p1015_p2  ;;  %p1022_p11 = por %p1021_p6, %p1020_p9 }
  0x5b   : > { %p1023_p13 = pnand %p1022_p11, %p1016_p8 }
  0x5d   : > { %1026 = shalt.err (!%p1023_p13)
}
  0x5e   : > { %878 = dma.hbm_to_vmem [thread:$0]  (!%p1358_p0), %s1418_s10, 128, %s1421_s11, %s245_s1  }
  0x5f   : > { %s289_s20 = scalar_lea.vmem [#allocation7], %s1352_s15  ;;  %s1027_s12 = scalar_lea.hbm %s1427_s23, 128 }
  0x60   : > { %s298_s25 = sshll.u32 %s289_s20, 4  ;;  %p1028_p12 = scmp.ne.s32.totalorder %s1427_s23, %s1027_s12  ;;  %s299_s25 = int_to_ptr.vmem [resolvable:$true] %s298_s25 }
  0x61   : > { %s1032_s29 = scalar_lea.hbm %s1624_s2, 512  ;;  %p1033_p5 = scmp.lt.u32.totalorder %s1427_s23, %s1624_s2 }
  0x62   : > { %p1030_p6 = pnand %p1028_p12, %p1382_p4  ;;  %p1034_p7 = scmp.lt.u32.totalorder %s1032_s29, %s1027_s12 }
  0x63   : > { %p1036_p1 = scmp.lt.u32.totalorder %s1027_s12, %s1427_s23 }
  0x64   : > { %p1031_p3 = pneg %p1030_p6  ;;  %p1035_p10 = por %p1034_p7, %p1033_p5 }
  0x66   : > { %p1037_p2 = por %p1036_p1, %p1035_p10 }
  0x68   : > { %p1038_p8 = pnand %p1037_p2, %p1031_p3 }
  0x6a   : > { %1041 = shalt.err (!%p1038_p8)
}
  0x6b   : > { %s1042_s1 = scalar_lea.vmem %s299_s25, 128  ;;  %s1229_s10 = smov [#allocation7]  }
  0x6c   : > { %p1043_p9 = scmp.ne.s32.totalorder %s299_s25, %s1042_s1  ;;  %s1047_s11 = sshll.u32 %s1229_s10, 4  ;;  %s1048_s11 = int_to_ptr.vmem [resolvable:$false] %s1047_s11 }
  0x6d   : > { %s1049_s18 = scalar_lea.vmem %s1048_s11, 256  ;;  %p1050_p12 = scmp.lt.s32.totalorder %s299_s25, %s1048_s11 }
  0x6e   : > { %p1045_p11 = pnand %p1043_p9, %p1382_p4  ;;  %p1051_p6 = scmp.lt.s32.totalorder %s1049_s18, %s1042_s1 }
  0x70   : > { %p1046_p13 = pneg %p1045_p11  ;;  %p1052_p0 = por %p1051_p6, %p1050_p12 }
  0x72   : > { %p1053_p5 = pnand %p1052_p0, %p1046_p13 }
  0x74   : > { %1056 = shalt.err (!%p1053_p5)
}
  0x75   : > { %p1661_p7 = scmp.ne.s32.totalorder %s1655_s27, 0  ;;  %s1474_s17 = scalar_lea.hbm %s1625_s3, %s1362_s6 }
  0x76   : > { %s309_s16 = scalar_lea.vmem [#allocation8], %s1352_s15  ;;  %s306_s30 = scalar_lea.sflag [#allocation9], %s1346_s13 }
  0x77   : > { %884 = dma.hbm_to_vmem [thread:$0]  (!%p1661_p7), %s1427_s23, 128, %s299_s25, %s1376_s28  }
  0x78   : > { %s319_s29 = sshll.u32 %s309_s16, 4  ;;  %s1057_s7 = scalar_lea.hbm %s1474_s17, 128  ;;  %s320_s29 = int_to_ptr.vmem [resolvable:$true] %s319_s29 }
  0x79   : > { %p1058_p0 = scmp.ne.s32.totalorder %s1474_s17, %s1057_s7  ;;  %s1062_s23 = scalar_lea.hbm %s1625_s3, 512 }
  0x7a   : > { %p1063_p1 = scmp.lt.u32.totalorder %s1474_s17, %s1625_s3  ;;  %p1064_p2 = scmp.lt.u32.totalorder %s1062_s23, %s1057_s7 }
  0x7b   : > { %p1060_p3 = pnand %p1058_p0, %p1382_p4  ;;  %p1066_p9 = scmp.lt.u32.totalorder %s1057_s7, %s1474_s17 }
  0x7c   : > { %p1065_p8 = por %p1064_p2, %p1063_p1 }
  0x7d   : > { %p1061_p10 = pneg %p1060_p3 }
  0x7e   : > { %p1067_p11 = por %p1066_p9, %p1065_p8 }
  0x80   : > { %p1068_p13 = pnand %p1067_p11, %p1061_p10 }
  0x82   : > { %1071 = shalt.err (!%p1068_p13)
}
  0x83   : > { %s1072_s13 = scalar_lea.vmem %s320_s29, 128  ;;  %s1230_s15 = smov [#allocation8]  }
  0x84   : > { %p1073_p12 = scmp.ne.s32.totalorder %s320_s29, %s1072_s13  ;;  %s1077_s10 = sshll.u32 %s1230_s15, 4  ;;  %s1078_s10 = int_to_ptr.vmem [resolvable:$false] %s1077_s10 }
  0x85   : > { %s1079_s11 = scalar_lea.vmem %s1078_s10, 256  ;;  %p1080_p0 = scmp.lt.s32.totalorder %s320_s29, %s1078_s10 }
  0x86   : > { %p1075_p6 = pnand %p1073_p12, %p1382_p4  ;;  %p1081_p3 = scmp.lt.s32.totalorder %s1079_s11, %s1072_s13 }
  0x88   : > { %p1076_p5 = pneg %p1075_p6  ;;  %p1082_p7 = por %p1081_p3, %p1080_p0 }
  0x8a   : > { %p1083_p1 = pnand %p1082_p7, %p1076_p5 }
  0x8c   : > { %1086 = shalt.err (!%p1083_p1)
}
  0x8d   : > { %p1662_p2 = scmp.ne.s32.totalorder %s1655_s27, 0  ;;  %p1663_p10 = scmp.ne.s32.totalorder %s1660_s14, 0 }
  0x8e   : > { %s1498_s24 = sand.u32 (!%p1663_p10), 1, %s1201_s19   ;;  %p1664_p4 = scmp.ne.s32.totalorder (!%p1663_p10), %s1650_s8, 0 }
  0x8f   : > { %887 = dma.hbm_to_vmem [thread:$0]  (!%p1662_p2), %s1474_s17, 128, %s320_s29, %s306_s30  }
  0x90   : > { %328 = sbr.rel (%p1663_p10) target bundleno = 917 (0x395), region = 36  ;;  %s1501_s18 = sshll.u32 (!%p1663_p10), %s1498_s24, 3 }
  0x91   : > { %s331_s20 = scalar_lea.sflag (!%p1663_p10), [#allocation3], %s1498_s24  ;;  %s334_s12 = scalar_lea.vmem (!%p1663_p10), [#allocation2], %s1501_s18 }
  0x97   : > { %1176 = dma.done.wait (%p1664_p4), %s331_s20, 128  }
  0x98   : > { %1178 = vsyncadd (%p1664_p4), %s331_s20, 4294967168  ;;  %s339_s27 = sand.u32 1, %s1306_s26   ;;  %s343_s17 = scalar_lea.vmem [#allocation5], %s1501_s18 }
  0x99   : > { %s340_s14 = scalar_lea.sflag [#allocation6], %s339_s27 }
  0x9a   : > { %1180 = dma.done.wait (%p1664_p4), %s340_s14, 256  }
  0x9b   : > { %1182 = vsyncadd (%p1664_p4), %s340_s14, 4294967040  ;;  %s352_s16 = scalar_lea.vmem [#allocation7], %s1501_s18  ;;  %s358_s29 = scalar_lea.sflag [#allocation9], %s1498_s24 }
  0x9c   : > { %s361_s30 = scalar_lea.vmem [#allocation8], %s1501_s18 }
  0x9d   : > { %1184 = dma.done.wait (%p1664_p4), %s358_s29, 128  }
  0x9e   : > { %1186 = vsyncadd (%p1664_p4), %s358_s29, 4294967168  ;;  %v1231_v0 = vmov 0.0   ;;  %vm1232_vm0 = vmmov 0   ;;  %vm413_vm1 = vcmask 523264   ;;  %v409_v1 = vld [vmem:[%s343_s17] sm:$0xff]  ;;  %v408_v2 = vld [vmem:[%s334_s12] sm:$0xff] }
  0x9f   : > { %853 = vmatprep.subr.mxu0 %v1231_v0  ;;  %855 = vmatprep.mubr.msk.f32.mxu0 %vm1232_vm0, %v1231_v0  ;;  %v412_v3 = vmul.f32 0.125, %v408_v2  ;;  %v411_v4 = vld [vmem:[%s361_s30] sm:$0xff]  ;;  %vm492_vm3 = vcmask 64512   ;;  %v410_v14 = vld [vmem:[%s352_s16] sm:$0xff]  ;;  %s407_s26 = scalar_lea.vmem [#allocation11], %s1501_s18  ;;  %s843_s8 = sshll.u32 %s1213_s22, 1 }
  0xa0   : > { %858 = vmatprep.subr.mxu1 %v1231_v0  ;;  %860 = vmatprep.mubr.msk.f32.mxu1 %vm1232_vm0, %v1231_v0  ;;  %vm490_vm2 = vcmp.eq.s32.totalorder %v411_v4, 0  ;;  %s1533_s7 = sadd.s32 %s1209_s21, %s843_s8  ;;  %s617_s6 = sshll.u32 %s407_s26, 4  ;;  %s618_s6 = int_to_ptr.vmem [resolvable:$true] %s617_s6 }
  0xa1   : > { %854 = vmatpush3.xpose.msk.msra.mxu0 %vm413_vm1, %v409_v1  ;;  %859 = vmatpush3.msra.mxu1 %v410_v14  ;;  %s844_s1 = sshll.u32 %s1533_s7, 7  ;;  %s585_s13 = scalar_lea.sflag [#allocation12], %s1498_s24 }
  0xa2   : > { %s1541_s25 = scalar_lea.hbm %s1627_s5, %s844_s1  ;;  %s1087_s15 = scalar_lea.vmem %s618_s6, 128 }
  0xa3   : > { %p1088_p7 = scmp.ne.s32.totalorder %s618_s6, %s1087_s15  ;;  %p1665_p8 = scmp.ne.s32.totalorder %s1651_s9, 0 }
  0xa4   : > { %856 = vmatmul.mubr.msk.f32.vlgmr.msra.gmra.mrb[0].mxu0 %vm413_vm1, %v412_v3  ;;  %s1233_s22 = smov [#allocation11]  }
  0xa5   : > { %p1089_p9 = pnand %p1088_p7, %p1665_p8  ;;  %s1091_s21 = sshll.u32 %s1233_s22, 4  ;;  %s1092_s21 = int_to_ptr.vmem [resolvable:$false] %s1091_s21 }
  0xa6   : > { %s1093_s10 = scalar_lea.vmem %s1092_s21, 256  ;;  %p1094_p13 = scmp.lt.s32.totalorder %s618_s6, %s1092_s21 }
  0xa7   : > { %p1090_p11 = pneg %p1089_p9  ;;  %p1095_p12 = scmp.lt.s32.totalorder %s1093_s10, %s1087_s15 }
  0xa9   : > { %p1096_p6 = por %p1095_p12, %p1094_p13 }
  0xab   : > { %p1097_p5 = pnand %p1096_p6, %p1090_p11 }
 0x177   : > { %v486_v5 = vpop.f32.mrb[0].mxu0 }
 0x178   : > { %v491_v6 = vsel %vm490_vm2, -1e+09, %v486_v5  ;;  %v857_v7 = vpop.f32.mrb[1].mxu0 }
 0x179   : > { %v493_v8 = vsel %vm492_vm3, %v491_v6, -inf }
 0x17a   : > { %494 = vmax.xlane.f32.xlu0 %v493_v8 }
 0x207   : > { %v495_v9 = vpop.xlane.xlu0 %494 }
 0x208   : > { %v496_v10 = vsub.f32 %v491_v6, %v495_v9 }
 0x20a   : > { %v497_v11 = vmul.f32 1.442695, %v496_v10 }
 0x20c   : > { %963 = vpow2.f32 %v497_v11 }
 0x216   : > { %v964_v12 = vpop.eup %963 }
 0x217   : > { %v499_v13 = vsel %vm492_vm3, %v964_v12, 0.0 }
 0x218   : > { %500 = vadd.xlane.f32.xlu0 %v499_v13 }
 0x2a5   : > { %v501_v15 = vpop.xlane.xlu0 %500 }
 0x2a6   : > { %965 = vrcp.f32 %v501_v15 }
 0x2b0   : > { %v966_v16 = vpop.eup %965 }
 0x2b1   : > { %v503_v17 = vmul.f32 %v966_v16, %v964_v12 }
 0x2b3   : > { %861 = vmatmul.mubr.msk.f32.vlgmr.msra.gmra.mrb[0].mxu1 %vm492_vm3, %v503_v17  ;;  %578 = vst.msk [vmem:[%s407_s26] sm:$0xff] %vm492_vm3, %v503_v17 }
 0x2b4   : > { %1100 = shalt.err (!%p1097_p5)
}
 0x2b5   : > { %s1101_s11 = scalar_lea.hbm %s1541_s25, 128  ;;  %s1105_s27 = scalar_lea.hbm %s1627_s5, 512 }
 0x2b6   : > { %p1102_p0 = scmp.ne.s32.totalorder %s1541_s25, %s1101_s11  ;;  %p1106_p2 = scmp.lt.u32.totalorder %s1541_s25, %s1627_s5 }
 0x2b7   : > { %p1107_p10 = scmp.lt.u32.totalorder %s1105_s27, %s1101_s11  ;;  %p1109_p7 = scmp.lt.u32.totalorder %s1101_s11, %s1541_s25 }
 0x2b8   : > { %p1103_p3 = pnand %p1102_p0, %p1665_p8 }
 0x2b9   : > { %p1108_p4 = por %p1107_p10, %p1106_p2 }
 0x2ba   : > { %p1104_p1 = pneg %p1103_p3 }
 0x2bb   : > { %p1110_p9 = por %p1109_p7, %p1108_p4 }
 0x2bd   : > { %p1111_p11 = pnand %p1110_p9, %p1104_p1 }
 0x2bf   : > { %1114 = shalt.err (!%p1111_p11)
}
 0x2c0   : > { %872 = dma.vmem_to_hbm [thread:$0]  (%p1665_p8), %s618_s6, 128, %s1541_s25, %s585_s13  }
 0x2c1   : > { %s400_s16 = scalar_lea.vmem [#allocation10], %s1501_s18  ;;  %s1567_s8 = scalar_lea.hbm %s1626_s4, %s844_s1 }
 0x2c2   : > { %s601_s29 = sshll.u32 %s400_s16, 4  ;;  %s580_s28 = scalar_lea.sflag [#allocation4], %s1498_s24  ;;  %s1569_s29 = int_to_ptr.vmem [resolvable:$true] %s601_s29 }
 0x2c3   : > { %s1115_s23 = scalar_lea.vmem %s1569_s29, 128  ;;  %s1234_s18 = smov [#allocation10]  }
 0x2c4   : > { %p1116_p13 = scmp.ne.s32.totalorder %s1569_s29, %s1115_s23  ;;  %s1119_s7 = sshll.u32 %s1234_s18, 4  ;;  %s1120_s7 = int_to_ptr.vmem [resolvable:$false] %s1119_s7 }
 0x2c5   : > { %s1121_s1 = scalar_lea.vmem %s1120_s7, 256  ;;  %p1122_p5 = scmp.lt.s32.totalorder %s1569_s29, %s1120_s7 }
 0x2c6   : > { %p1117_p12 = pnand %p1116_p13, %p1665_p8  ;;  %p1123_p0 = scmp.lt.s32.totalorder %s1121_s1, %s1115_s23 }
 0x2c8   : > { %p1118_p6 = pneg %p1117_p12  ;;  %p1124_p3 = por %p1123_p0, %p1122_p5 }
 0x2ca   : > { %p1125_p1 = pnand %p1124_p3, %p1118_p6 }
 0x386   : > { %v573_v18 = vpop.f32.mrb[0].mxu1 }
 0x387   : > { %577 = vst.msk [vmem:[%s400_s16] sm:$0xff] %vm413_vm1, %v573_v18  ;;  %v862_v19 = vpop.f32.mrb[1].mxu1 }
 0x388   : > { %1128 = shalt.err (!%p1125_p1)
}
 0x389   : > { %s1129_s24 = scalar_lea.hbm %s1567_s8, 128  ;;  %s1133_s13 = scalar_lea.hbm %s1626_s4, 512 }
 0x38a   : > { %p1130_p2 = scmp.ne.s32.totalorder %s1567_s8, %s1129_s24  ;;  %p1134_p7 = scmp.lt.u32.totalorder %s1567_s8, %s1626_s4 }
 0x38b   : > { %p1135_p9 = scmp.lt.u32.totalorder %s1133_s13, %s1129_s24  ;;  %p1137_p13 = scmp.lt.u32.totalorder %s1129_s24, %s1567_s8 }
 0x38c   : > { %p1131_p10 = pnand %p1130_p2, %p1665_p8 }
 0x38d   : > { %p1136_p11 = por %p1135_p9, %p1134_p7 }
 0x38e   : > { %p1132_p4 = pneg %p1131_p10 }
 0x38f   : > { %p1138_p12 = por %p1137_p13, %p1136_p11 }
 0x391   : > { %p1139_p6 = pnand %p1138_p12, %p1132_p4 }
 0x393   : > { %1142 = shalt.err (!%p1139_p6)
}
 0x394   : > { %871 = dma.vmem_to_hbm [thread:$0]  (%p1665_p8), %s1569_s29, 128, %s1567_s8, %s580_s28  }
 0x395 PF: > { %s1666_s21 = sld [smem:[#allocation22_spill]]  ;;  %s1667_s10 = sld [smem:[#allocation18_spill]] }
 0x396   : > { %s1668_s11 = sld [smem:[#allocation25_spill]] }
 0x39b   : > { %p896_p5 = scmp.ge.s32.totalorder %s1666_s21, 2  ;;  %s629_s20 = sand.u32 1, %s1667_s10  }
 0x39c   : > { %p1669_p0 = scmp.ne.s32.totalorder %s1668_s11, 0  ;;  %s630_s12 = scalar_lea.sflag [#allocation4], %s629_s20 }
 0x39e   : > { %p889_p3 = pnand %p896_p5, %p1669_p0 }
 0x3a0   : > { %1188 = dma.done.wait (!%p889_p3), %s630_s12, 128  }
 0x3a1   : > { %1190 = vsyncadd (!%p889_p3), %s630_s12, 4294967168  ;;  %s639_s27 = scalar_lea.sflag [#allocation12], %s629_s20 }
 0x3a2   : > { %1192 = dma.done.wait (!%p889_p3), %s639_s27, 128  }
 0x3a3   : > { %1194 = vsyncadd (!%p889_p3), %s639_s27, 4294967168  ;;  %s31_s25 = sadd.s32 1, %s1666_s21   ;;  %s1670_s9 = sld [smem:[#allocation19_spill]] }
 0x3a4   : > { %p28_p1 = scmp.ge.s32.totalorder %s31_s25, 6   ;;  %s1671_s20 = sld [smem:[#allocation26_spill]] }
 0x3a5   : > { %s1672_s21 = sld [smem:[#allocation20_spill]]  ;;  %s1673_s22 = sld [smem:[#allocation21_spill]] }
 0x3a6   : > { %s1674_s23 = sld [smem:[#allocation23_spill]]  ;;  %s1675_s24 = sld [smem:[#allocation24_spill]] }
 0x3a7   : > { %s1676_s18 = smov %s1201_s19  ;;  %30 = sbr.rel (!%p28_p1) target bundleno = 15 (0xf), region = 135 }
 0x3a9   : > { %s1677_s19 = smov %s1670_s9 }
 0x3ae   :  { %644 = vsyncpa [#allocation3], 1 }
 0x3af   :  { %646 = vsyncpa [#allocation3 + $0x1], 1 }
 0x3b0   :  { %647 = vsyncpa [#allocation6], 1 }
 0x3b1   :  { %649 = vsyncpa [#allocation6 + $0x1], 1 }
 0x3b2   :  { %650 = vsyncpa [#allocation9], 1 }
 0x3b3   :  { %652 = vsyncpa [#allocation9 + $0x1], 1 }
 0x3b4   :  { %653 = vsyncpa [#allocation4], 1 }
 0x3b5   :  { %655 = vsyncpa [#allocation4 + $0x1], 1 }
 0x3b6   :  { %656 = vsyncpa [#allocation12], 1 }
 0x3b7   :  { %658 = vsyncpa [#allocation12 + $0x1], 1 }

</bundles_post_ra>
